<compile_context>
chip_gen: v5e
topology: v5e:2x2
jax: 0.10.0
libtpu: 0.0.40
codegen_flags: <defaults>
</compile_context>

<pallas_src>
import functools

import jax
import jax.numpy as jnp
from jax.experimental import pallas as pl
from jax.experimental.pallas import tpu as pltpu

C_IN = 4     # input channels
K = 3        # conv kernel size (3x3, stride 1, padding 1)
C_MID = 32   # conv output channels (per branch)
FEAT = 64    # feature embedding dim (per branch)
CK = C_IN * K * K          # 36 im2col columns per branch
CK2 = 2 * CK               # 72  (both branches packed along lanes)
MID2 = 2 * C_MID           # 64
FEAT2 = 2 * FEAT           # 128 (lane-dense output)


def _siamese_kernel(p_ref, w1_ref, b1_ref, w2_ref, b2_ref, o_ref, acc_ref,
                    *, inv_hw):
    # p_ref  : (B, THW, 2*CK)   bf16  im2col patches, branch1 | branch2 in lanes
    # w1_ref : (2*CK, 2*C_MID)  bf16  block-diag(w1, w1)
    # b1_ref : (1, 2*C_MID)     f32   [b1, b1]
    # w2_ref : (2*C_MID, 2*FEAT) f32  block-diag(w2, w2)
    # b2_ref : (1, 2*FEAT)      f32   [b2, b2]
    # o_ref  : (B, 2*FEAT)      f32   features, branch1 | branch2 in lanes
    # acc_ref: (B, 2*C_MID)     f32   running pooled sum across HW tiles
    t = pl.program_id(0)

    @pl.when(t == 0)
    def _():
        acc_ref[...] = jnp.zeros_like(acc_ref)

    b, thw, ck2 = p_ref.shape
    # One batched MXU matmul for both branches and all batch rows of this tile.
    p = p_ref[...].reshape(b * thw, ck2)                       # bf16
    h = jnp.dot(p, w1_ref[...], preferred_element_type=jnp.float32)
    h = jnp.maximum(h + b1_ref[...], 0.0)                      # bias + ReLU, f32
    # Partial global-average-pool sum (exact: ReLU is pointwise).
    acc_ref[...] += h.reshape(b, thw, h.shape[-1]).sum(axis=1)

    @pl.when(t == pl.num_programs(0) - 1)
    def _():
        pooled = acc_ref[...] * inv_hw                         # (B, 64) f32 mean
        feats = jnp.dot(pooled, w2_ref[...],
                        preferred_element_type=jnp.float32) + b2_ref[...]
        o_ref[...] = feats.astype(o_ref.dtype)                 # (B, 128) lane-dense


def _im2col(x):
    # x: (B, C, H, W) NCHW -> (B, H*W, C*K*K) for a 3x3 / stride 1 / pad 1 conv.
    B, C, H, W = x.shape
    xp = jnp.pad(x, ((0, 0), (0, 0), (1, 1), (1, 1)))
    cols = []
    for dh in range(K):
        for dw in range(K):
            cols.append(xp[:, :, dh:dh + H, dw:dw + W])
    p = jnp.stack(cols, axis=2)                      # (B, C, K*K, H, W)
    p = p.transpose(0, 3, 4, 1, 2).reshape(B, H * W, C * K * K)
    return p


def _pick_hw_tile(hw):
    # Largest tile (multiple of 8, divisor of HW) up to 512 rows per step.
    for cand in (512, 256, 128, 64, 32, 16, 8):
        if hw % cand == 0:
            return cand
    return hw


def siamese_forward(x1, x2, params):
    """Mirrors SiameseNN.forward: the SAME extractor applied to x1 and x2."""
    w1, b1, w2, b2 = params
    B, C, H, W = x1.shape
    assert x2.shape == x1.shape
    HW = H * W

    # Both branches' patches packed side by side along the lane axis (bf16).
    p1 = _im2col(x1)                                           # (B, HW, CK)
    p2 = _im2col(x2)                                           # (B, HW, CK)
    patches = jnp.concatenate([p1, p2], axis=-1).astype(jnp.bfloat16)  # (B,HW,72)

    # Shared weights replicated block-diagonally: one matmul serves both branches.
    w1_bf = w1.astype(jnp.bfloat16)
    w1b = jnp.zeros((CK2, MID2), jnp.bfloat16)
    w1b = w1b.at[:CK, :C_MID].set(w1_bf).at[CK:, C_MID:].set(w1_bf)
    b1b = jnp.concatenate([b1, b1], axis=-1)                   # (1, 64) f32
    w2b = jnp.zeros((MID2, FEAT2), jnp.float32)
    w2b = w2b.at[:C_MID, :FEAT].set(w2).at[C_MID:, FEAT:].set(w2)
    b2b = jnp.concatenate([b2, b2], axis=-1)                   # (1, 128) f32

    thw = _pick_hw_tile(HW)
    grid = (HW // thw,)
    inv_hw = 1.0 / float(HW)
    kernel = functools.partial(_siamese_kernel, inv_hw=inv_hw)

    out = pl.pallas_call(
        kernel,
        out_shape=jax.ShapeDtypeStruct((B, FEAT2), jnp.float32),
        grid_spec=pltpu.PrefetchScalarGridSpec(
            num_scalar_prefetch=0,
            grid=grid,
            in_specs=[
                pl.BlockSpec((B, thw, CK2), lambda t: (0, t, 0)),
                pl.BlockSpec((CK2, MID2), lambda t: (0, 0)),
                pl.BlockSpec((1, MID2), lambda t: (0, 0)),
                pl.BlockSpec((MID2, FEAT2), lambda t: (0, 0)),
                pl.BlockSpec((1, FEAT2), lambda t: (0, 0)),
            ],
            out_specs=pl.BlockSpec((B, FEAT2), lambda t: (0, 0)),
            scratch_shapes=[pltpu.VMEM((B, MID2), jnp.float32)],
        ),
        # HW tiles form a reduction into the resident output/accumulator.
        # (No explicit vmem_limit_bytes needed at these sizes; set it when
        #  scaling HW tiles up, especially on v5e's 16 MiB scoped default.)
        compiler_params=pltpu.CompilerParams(
            dimension_semantics=("arbitrary",)),
    )(patches, w1b, b1b, w2b, b2b)

    # Branch 1 features in lanes [:FEAT], branch 2 in lanes [FEAT:].
    return out[:, :FEAT], out[:, FEAT:]


def init_params(key):
    # Deterministic synthetic weights (stand-in for the pretrained extractor).
    k1, k2 = jax.random.split(key)
    w1 = 0.1 * jax.random.normal(k1, (CK, C_MID), jnp.float32)
    b1 = jnp.zeros((1, C_MID), jnp.float32)
    w2 = 0.1 * jax.random.normal(k2, (C_MID, FEAT), jnp.float32)
    b2 = jnp.zeros((1, FEAT), jnp.float32)
    return (w1, b1, w2, b2)


if __name__ == "__main__":
    key = jax.random.PRNGKey(0)
    kp, kx1, kx2 = jax.random.split(key, 3)
    params = init_params(kp)

    # Small NCHW inputs: batch=2, channels=4, spatial=16x16.
    x1 = jax.random.normal(kx1, (2, C_IN, 16, 16), jnp.float32)
    x2 = jax.random.normal(kx2, (2, C_IN, 16, 16), jnp.float32)

    fwd = jax.jit(functools.partial(siamese_forward, params=params))
    out1, out2 = fwd(x1, x2)
    jax.block_until_ready((out1, out2))

    assert out1.shape == (2, FEAT) and out2.shape == (2, FEAT)
    assert out1.dtype == jnp.float32 and out2.dtype == jnp.float32
    print("KERNEL_OK")
</pallas_src>

<mosaic_0001>
module attributes {stable_mosaic.version = 11 : i64} {
  func.func @_siamese_kernel(%arg0: i32, %arg1: memref<2x256x72xbf16, #tpu.memory_space<vmem>>, %arg2: memref<72x64xbf16, #tpu.memory_space<vmem>>, %arg3: memref<1x64xf32, #tpu.memory_space<vmem>>, %arg4: memref<64x128xf32, #tpu.memory_space<vmem>>, %arg5: memref<1x128xf32, #tpu.memory_space<vmem>>, %arg6: memref<2x128xf32, #tpu.memory_space<vmem>>, %arg7: memref<2x64xf32, #tpu.memory_space<vmem>>) attributes {dimension_semantics = [#tpu.dimension_semantics<arbitrary>], iteration_bounds = array<i64: 1>, scalar_prefetch = 0 : i64, scratch_operands = 1 : i64, tpu.core_type = #tpu.core_type<tc>, window_params = [{transform_indices = @transform_0, window_bounds = array<i64: 2, 256, 72>}, {pipeline_mode = #tpu.pipeline_mode<synchronous>, transform_indices = @transform_1, window_bounds = array<i64: 72, 64>}, {pipeline_mode = #tpu.pipeline_mode<synchronous>, transform_indices = @transform_2, window_bounds = array<i64: 1, 64>}, {pipeline_mode = #tpu.pipeline_mode<synchronous>, transform_indices = @transform_3, window_bounds = array<i64: 64, 128>}, {pipeline_mode = #tpu.pipeline_mode<synchronous>, transform_indices = @transform_4, window_bounds = array<i64: 1, 128>}, {pipeline_mode = #tpu.pipeline_mode<synchronous>, transform_indices = @transform_5, window_bounds = array<i64: 2, 128>}]} {
    %c0_i32 = arith.constant 0 : i32
    %0 = arith.cmpi eq, %arg0, %c0_i32 : i32
    %1 = arith.extui %0 : i1 to i32
    %c0_i32_0 = arith.constant 0 : i32
    %2 = arith.cmpi ne, %1, %c0_i32_0 : i32
    scf.if %2 {
      %cst_15 = arith.constant 0.000000e+00 : f32
      %20 = vector.broadcast %cst_15 : f32 to vector<2x64xf32>
      %c0_16 = arith.constant 0 : index
      %c0_17 = arith.constant 0 : index
      %21 = vector.load %arg7[%c0_16, %c0_17] : memref<2x64xf32, #tpu.memory_space<vmem>>, vector<2x64xf32>
      tpu.vector_store %arg7[%c0_16, %c0_17], %20 {strides = array<i32>} : memref<2x64xf32, #tpu.memory_space<vmem>>, vector<2x64xf32>,
    } else {
    }
    %c0 = arith.constant 0 : index
    %c0_1 = arith.constant 0 : index
    %c0_2 = arith.constant 0 : index
    %3 = vector.load %arg1[%c0, %c0_1, %c0_2] : memref<2x256x72xbf16, #tpu.memory_space<vmem>>, vector<2x256x72xbf16>
    %4 = vector.shape_cast %3 : vector<2x256x72xbf16> to vector<512x72xbf16>
    %c0_3 = arith.constant 0 : index
    %c0_4 = arith.constant 0 : index
    %5 = vector.load %arg2[%c0_3, %c0_4] : memref<72x64xbf16, #tpu.memory_space<vmem>>, vector<72x64xbf16>
    %cst = arith.constant dense<0.000000e+00> : vector<512x64xf32>
    %6 = tpu.matmul %4, %5, %cst {dimension_numbers = #tpu.dot_dimension_numbers<[1], [0], [0], [1], [0, 0, 1, 1], [], []>} : vector<512x72xbf16>, vector<72x64xbf16>, vector<512x64xf32> -> vector<512x64xf32>
    %c0_5 = arith.constant 0 : index
    %c0_6 = arith.constant 0 : index
    %7 = vector.load %arg3[%c0_5, %c0_6] : memref<1x64xf32, #tpu.memory_space<vmem>>, vector<1x64xf32>
    %8 = vector.broadcast %7 : vector<1x64xf32> to vector<512x64xf32>
    %9 = arith.addf %6, %8 : vector<512x64xf32>
    %cst_7 = arith.constant 0.000000e+00 : f32
    %10 = vector.broadcast %cst_7 : f32 to vector<512x64xf32>
    %11 = arith.maximumf %9, %10 : vector<512x64xf32>
    %c0_8 = arith.constant 0 : index
    %c0_9 = arith.constant 0 : index
    %12 = vector.load %arg7[%c0_8, %c0_9] : memref<2x64xf32, #tpu.memory_space<vmem>>, vector<2x64xf32>
    %13 = vector.shape_cast %11 : vector<512x64xf32> to vector<2x256x64xf32>
    %cst_10 = arith.constant dense<0.000000e+00> : vector<2x64xf32>
    %14 = vector.multi_reduction <add>, %13, %cst_10 [1] : vector<2x256x64xf32> to vector<2x64xf32>
    %15 = arith.addf %12, %14 : vector<2x64xf32>
    %c0_11 = arith.constant 0 : index
    %c0_12 = arith.constant 0 : index
    %16 = vector.load %arg7[%c0_11, %c0_12] : memref<2x64xf32, #tpu.memory_space<vmem>>, vector<2x64xf32>
    tpu.vector_store %arg7[%c0_11, %c0_12], %15 {strides = array<i32>} : memref<2x64xf32, #tpu.memory_space<vmem>>, vector<2x64xf32>,
    %c0_i32_13 = arith.constant 0 : i32
    %17 = arith.cmpi eq, %arg0, %c0_i32_13 : i32
    %18 = arith.extui %17 : i1 to i32
    %c0_i32_14 = arith.constant 0 : i32
    %19 = arith.cmpi ne, %18, %c0_i32_14 : i32
    scf.if %19 {
      %c0_15 = arith.constant 0 : index
      %c0_16 = arith.constant 0 : index
      %20 = vector.load %arg7[%c0_15, %c0_16] : memref<2x64xf32, #tpu.memory_space<vmem>>, vector<2x64xf32>
      %cst_17 = arith.constant 3.906250e-03 : f32
      %21 = vector.broadcast %cst_17 : f32 to vector<2x64xf32>
      %22 = arith.mulf %20, %21 : vector<2x64xf32>
      %c0_18 = arith.constant 0 : index
      %c0_19 = arith.constant 0 : index
      %23 = vector.load %arg4[%c0_18, %c0_19] : memref<64x128xf32, #tpu.memory_space<vmem>>, vector<64x128xf32>
      %cst_20 = arith.constant dense<0.000000e+00> : vector<2x128xf32>
      %24 = tpu.matmul %22, %23, %cst_20 {dimension_numbers = #tpu.dot_dimension_numbers<[1], [0], [0], [1], [0, 0, 1, 1], [], []>} : vector<2x64xf32>, vector<64x128xf32>, vector<2x128xf32> -> vector<2x128xf32>
      %c0_21 = arith.constant 0 : index
      %c0_22 = arith.constant 0 : index
      %25 = vector.load %arg5[%c0_21, %c0_22] : memref<1x128xf32, #tpu.memory_space<vmem>>, vector<1x128xf32>
      %26 = vector.broadcast %25 : vector<1x128xf32> to vector<2x128xf32>
      %27 = arith.addf %24, %26 : vector<2x128xf32>
      %c0_23 = arith.constant 0 : index
      %c0_24 = arith.constant 0 : index
      %28 = vector.load %arg6[%c0_23, %c0_24] : memref<2x128xf32, #tpu.memory_space<vmem>>, vector<2x128xf32>
      tpu.vector_store %arg6[%c0_23, %c0_24], %27 {strides = array<i32>} : memref<2x128xf32, #tpu.memory_space<vmem>>, vector<2x128xf32>,
    } else {
    }
    return
  }
  func.func @transform_0(%arg0: i32) -> (i32, i32, i32) {
    %c0_i32 = arith.constant 0 : i32
    %c0_i32_0 = arith.constant 0 : i32
    %c0_i32_1 = arith.constant 0 : i32
    return %c0_i32, %arg0, %c0_i32_0 : i32, i32, i32
  }
  func.func @transform_1(%arg0: i32) -> (i32, i32) {
    %c0_i32 = arith.constant 0 : i32
    %c0_i32_0 = arith.constant 0 : i32
    %c0_i32_1 = arith.constant 0 : i32
    return %c0_i32, %c0_i32_0 : i32, i32
  }
  func.func @transform_2(%arg0: i32) -> (i32, i32) {
    %c0_i32 = arith.constant 0 : i32
    %c0_i32_0 = arith.constant 0 : i32
    %c0_i32_1 = arith.constant 0 : i32
    return %c0_i32, %c0_i32_0 : i32, i32
  }
  func.func @transform_3(%arg0: i32) -> (i32, i32) {
    %c0_i32 = arith.constant 0 : i32
    %c0_i32_0 = arith.constant 0 : i32
    %c0_i32_1 = arith.constant 0 : i32
    return %c0_i32, %c0_i32_0 : i32, i32
  }
  func.func @transform_4(%arg0: i32) -> (i32, i32) {
    %c0_i32 = arith.constant 0 : i32
    %c0_i32_0 = arith.constant 0 : i32
    %c0_i32_1 = arith.constant 0 : i32
    return %c0_i32, %c0_i32_0 : i32, i32
  }
  func.func @transform_5(%arg0: i32) -> (i32, i32) {
    %c0_i32 = arith.constant 0 : i32
    %c0_i32_0 = arith.constant 0 : i32
    %c0_i32_1 = arith.constant 0 : i32
    return %c0_i32, %c0_i32_0 : i32, i32
  }
}

</mosaic_0001>

<bundles_post_ra>
// kernel: siamese_forward.1
= control target key start
LH: loop header
LB: loop body
LE: loop exit
PB: predicated region body
PF: predicated region fallthrough
CT: control target
= control target key end

     0   :  { %vm388_vm0 = vcmask 1043456   ;;  %vm291_vm1 = vcmask 588800   ;;  %vm626_vm2 = vcmask 523264   ;;  %vm25_vm3 = vcmask 517120   ;;  %s1500_s1 = inlined_call_operand.vmem [shape: bf16[72,64], index: 1, kind: input, shape index: {}]   ;;  %s1501_s2 = inlined_call_operand.vmem [shape: f32[1,64], index: 2, kind: input, shape index: {}]   ;;  %s1502_s0 = inlined_call_operand.vmem [shape: bf16[2,256,72], index: 0, kind: input, shape index: {}]   ;;  %s1503_s3 = inlined_call_operand.vmem [shape: f32[64,128], index: 3, kind: input, shape index: {}]   ;;  %s1504_s4 = inlined_call_operand.vmem [shape: f32[1,128], index: 4, kind: input, shape index: {}]   ;;  %s1505_s5 = inlined_call_operand.vmem [shape: f32[2,128], index: 5, kind: output, shape index: {}]  }
   0x1   :  { %v99_v0 = vld [vmem:[%s1500_s1 + $0x20] sm:$0xf]  ;;  %v1030_v4 = vld [vmem:[%s1500_s1 + $0x18] sm:$0xff]  ;;  %v1029_v5 = vld [vmem:[%s1500_s1 + $0x10] sm:$0xff]  ;;  %vm767_vm4 = vcmask 1041409  }
   0x2   :  { %v281_v1 = vunpack.c.l.b16 %v99_v0  ;;  %v1028_v6 = vld [vmem:[%s1500_s1 + $0x8] sm:$0xff]  ;;  %v1027_v7 = vld [vmem:[%s1500_s1] sm:$0xff]  ;;  %v1009_v9 = vld [vmem:[%s1502_s0 + $0x70] sm:$0xff] }
   0x3   :  { %v995_v8 = vld [vmem:[%s1502_s0] sm:$0xff]  ;;  %v1018_v10 = vld [vmem:[%s1502_s0 + $0xb8] sm:$0xff]  ;;  %v996_v11 = vld [vmem:[%s1502_s0 + $0x8] sm:$0xff] }
   0x4   :  { %v286_v2 = vpack.c.b16 %v281_v1, %v281_v1  ;;  %v1010_v12 = vld [vmem:[%s1502_s0 + $0x78] sm:$0xff]  ;;  %v1019_v13 = vld [vmem:[%s1502_s0 + $0xc0] sm:$0xff]  ;;  %v997_v15 = vld [vmem:[%s1502_s0 + $0x10] sm:$0xff] }
   0x5   :  { %v1003_v14 = vld [vmem:[%s1502_s0 + $0x40] sm:$0xff]  ;;  %v1020_v17 = vld [vmem:[%s1502_s0 + $0xc8] sm:$0xff]  ;;  %v998_v19 = vld [vmem:[%s1502_s0 + $0x18] sm:$0xff] }
   0x6   :  { %v390_v3 = vsel %vm388_vm0, %v286_v2, 0  ;;  %v1011_v16 = vld [vmem:[%s1502_s0 + $0x80] sm:$0xff]  ;;  %v1004_v18 = vld [vmem:[%s1502_s0 + $0x48] sm:$0xff]  ;;  %v1021_v21 = vld [vmem:[%s1502_s0 + $0xd0] sm:$0xff] }
   0x7   :  { %395 = vmatpush.bf16.msra.mxu0 %v390_v3  ;;  %1032 = vmatpush.bf16.msra.mxu2 %v390_v3  ;;  %v1012_v20 = vld [vmem:[%s1502_s0 + $0x88] sm:$0xff]  ;;  %v1005_v22 = vld [vmem:[%s1502_s0 + $0x50] sm:$0xff]  ;;  %v999_v23 = vld [vmem:[%s1502_s0 + $0x20] sm:$0xff] }
   0x8   :  { %1033 = vmatpush.bf16.msra.mxu3 %v390_v3  ;;  %1031 = vmatpush.bf16.msra.mxu1 %v390_v3  ;;  %v1013_v24 = vld [vmem:[%s1502_s0 + $0x90] sm:$0xff]  ;;  %v1022_v25 = vld [vmem:[%s1502_s0 + $0xd8] sm:$0xff]  ;;  %v1000_v27 = vld [vmem:[%s1502_s0 + $0x28] sm:$0xff] }
   0x9   :  { %v1006_v26 = vld [vmem:[%s1502_s0 + $0x58] sm:$0xff]  ;;  %v1023_v29 = vld [vmem:[%s1502_s0 + $0xe0] sm:$0xff]  ;;  %v1001_v31 = vld [vmem:[%s1502_s0 + $0x30] sm:$0xff] }
   0xa   :  { %v1014_v28 = vld [vmem:[%s1502_s0 + $0x98] sm:$0xff]  ;;  %v1007_v30 = vld [vmem:[%s1502_s0 + $0x60] sm:$0xff]  ;;  %v1024_v33 = vld [vmem:[%s1502_s0 + $0xe8] sm:$0xff] }
   0xb   :  { %396 = vmatpush.bf16.msra.mxu0 %v1030_v4  ;;  %1035 = vmatpush.bf16.msra.mxu2 %v1030_v4  ;;  %v1015_v32 = vld [vmem:[%s1502_s0 + $0xa0] sm:$0xff]  ;;  %v1008_v34 = vld [vmem:[%s1502_s0 + $0x68] sm:$0xff]  ;;  %v1002_v35 = vld [vmem:[%s1502_s0 + $0x38] sm:$0xff] }
   0xc   :  { %1036 = vmatpush.bf16.msra.mxu3 %v1030_v4  ;;  %1034 = vmatpush.bf16.msra.mxu1 %v1030_v4  ;;  %v1016_v36 = vld [vmem:[%s1502_s0 + $0xa8] sm:$0xff]  ;;  %v1025_v37 = vld [vmem:[%s1502_s0 + $0xf0] sm:$0xff]  ;;  %v1026_v40 = vld [vmem:[%s1502_s0 + $0xf8] sm:$0xff] }
   0xd   :  { %v1017_v38 = vld [vmem:[%s1502_s0 + $0xb0] sm:$0xff]  ;;  %v1224_v41 = vld [vmem:[%s1501_s2] ss:$0 sm:$0xff] }
   0xf   :  { %397 = vmatpush.bf16.msra.mxu0 %v1029_v5  ;;  %1038 = vmatpush.bf16.msra.mxu2 %v1029_v5 }
  0x10   :  { %1039 = vmatpush.bf16.msra.mxu3 %v1029_v5  ;;  %1037 = vmatpush.bf16.msra.mxu1 %v1029_v5 }
  0x13   :  { %398 = vmatpush.bf16.msra.mxu0 %v1028_v6  ;;  %1041 = vmatpush.bf16.msra.mxu2 %v1028_v6 }
  0x14   :  { %1042 = vmatpush.bf16.msra.mxu3 %v1028_v6  ;;  %1040 = vmatpush.bf16.msra.mxu1 %v1028_v6 }
  0x17   :  { %399 = vmatpush.bf16.msra.mxu0 %v1027_v7  ;;  %1044 = vmatpush.bf16.msra.mxu2 %v1027_v7 }
  0x18   :  { %1045 = vmatpush.bf16.msra.mxu3 %v1027_v7  ;;  %1043 = vmatpush.bf16.msra.mxu1 %v1027_v7 }
  0x1a   :  { %962 = vmatmul.msk.bf16.vlgmr.msra.gmra.mxu0 %vm291_vm1, %v995_v8  ;;  %976 = vmatmul.msk.bf16.vlgmr.msra.gmra.mxu2 %vm291_vm1, %v1009_v9 }
  0x1b   :  { %985 = vmatmul.msk.bf16.vlgmr.msra.gmra.mxu3 %vm291_vm1, %v1018_v10  ;;  %970 = vmatmul.msk.bf16.vlgmr.msra.gmra.mxu1 %vm291_vm1, %v1003_v14 }
  0x2a   :  { %963 = vmatmul.msk.bf16.gmra.mxu0 %vm291_vm1, %v996_v11  ;;  %977 = vmatmul.msk.bf16.gmra.mxu2 %vm291_vm1, %v1010_v12 }
  0x2b   :  { %986 = vmatmul.msk.bf16.gmra.mxu3 %vm291_vm1, %v1019_v13  ;;  %971 = vmatmul.msk.bf16.gmra.mxu1 %vm291_vm1, %v1004_v18 }
  0x3a   :  { %964 = vmatmul.msk.bf16.gmra.mxu0 %vm291_vm1, %v997_v15  ;;  %978 = vmatmul.msk.bf16.gmra.mxu2 %vm291_vm1, %v1011_v16 }
  0x3b   :  { %987 = vmatmul.msk.bf16.gmra.mxu3 %vm291_vm1, %v1020_v17  ;;  %972 = vmatmul.msk.bf16.gmra.mxu1 %vm291_vm1, %v1005_v22 }
  0x4a   :  { %965 = vmatmul.msk.bf16.gmra.mxu0 %vm291_vm1, %v998_v19  ;;  %979 = vmatmul.msk.bf16.gmra.mxu2 %vm291_vm1, %v1012_v20 }
  0x4b   :  { %988 = vmatmul.msk.bf16.gmra.mxu3 %vm291_vm1, %v1021_v21  ;;  %973 = vmatmul.msk.bf16.gmra.mxu1 %vm291_vm1, %v1006_v26 }
  0x5a   :  { %966 = vmatmul.msk.bf16.gmra.mxu0 %vm291_vm1, %v999_v23  ;;  %980 = vmatmul.msk.bf16.gmra.mxu2 %vm291_vm1, %v1013_v24 }
  0x5b   :  { %989 = vmatmul.msk.bf16.gmra.mxu3 %vm291_vm1, %v1022_v25  ;;  %974 = vmatmul.msk.bf16.gmra.mxu1 %vm291_vm1, %v1007_v30 }
  0x6a   :  { %967 = vmatmul.msk.bf16.gmra.mxu0 %vm291_vm1, %v1000_v27  ;;  %981 = vmatmul.msk.bf16.gmra.mxu2 %vm291_vm1, %v1014_v28 }
  0x6b   :  { %990 = vmatmul.msk.bf16.gmra.mxu3 %vm291_vm1, %v1023_v29  ;;  %975 = vmatmul.msk.bf16.gmra.mxu1 %vm291_vm1, %v1008_v34 }
  0x7a   :  { %968 = vmatmul.msk.bf16.gmra.mxu0 %vm291_vm1, %v1001_v31  ;;  %982 = vmatmul.msk.bf16.gmra.mxu2 %vm291_vm1, %v1015_v32 }
  0x7b   :  { %991 = vmatmul.msk.bf16.gmra.mxu3 %vm291_vm1, %v1024_v33 }
  0x8a   :  { %969 = vmatmul.msk.bf16.gmra.mxu0 %vm291_vm1, %v1002_v35  ;;  %983 = vmatmul.msk.bf16.gmra.mxu2 %vm291_vm1, %v1016_v36 }
  0x8b   :  { %992 = vmatmul.msk.bf16.gmra.mxu3 %vm291_vm1, %v1025_v37 }
  0x97   :  { %v401_v39 = vpop.f32.mrf.mxu0 }
  0x98   :  { %v402_v42 = vadd.f32 %v1224_v41, %v401_v39  ;;  %v1247_v63 = vpop.f32.mrf.mxu1 }
  0x9a   :  { %984 = vmatmul.msk.bf16.gmra.mxu2 %vm291_vm1, %v1017_v38  ;;  %v561_v44 = vmax.f32 %v402_v42, 0.0 }
  0x9b   :  { %993 = vmatmul.msk.bf16.gmra.mxu3 %vm291_vm1, %v1026_v40 }
  0x9c   :  { %v627_v48 = vsel %vm626_vm2, %v561_v44, 0.0 }
  0x9d   :  { %v1229_v43 = vpop.f32.mrf.mxu2 }
  0x9e   :  { %v1231_v45 = vpop.f32.mrf.mxu3 }
  0x9f   :  { %v403_v46 = vpop.f32.mrf.mxu0 }
  0xa0   :  { %v404_v47 = vadd.f32 %v1224_v41, %v403_v46  ;;  %v1255_v8 = vpop.f32.mrf.mxu1 }
  0xa2   :  { %v562_v49 = vmax.f32 %v404_v47, 0.0 }
  0xa4   :  { %v628_v50 = vsel %vm626_vm2, %v562_v49, 0.0 }
  0xa5   :  { %v629_v51 = vadd.f32 %v628_v50, %v627_v48  ;;  %v1236_v52 = vpop.f32.mrf.mxu2  ;;  %v785_v48 = vld [vmem:[%s1503_s3 + $0x38] sm:$0xff] }
  0xa6   :  { %v1238_v53 = vpop.f32.mrf.mxu3  ;;  %801 = vmatpush.msrb.mxu1 %v785_v48  ;;  %v784_v48 = vld [vmem:[%s1503_s3 + $0x30] sm:$0xff] }
  0xa7   :  { %v406_v54 = vpop.f32.mrf.mxu0 }
  0xa8   :  { %v407_v55 = vadd.f32 %v1224_v41, %v406_v54  ;;  %v1261_v16 = vpop.f32.mrf.mxu1  ;;  %802 = vmatpush.msrb.mxu1 %v784_v48 }
  0xaa   :  { %v563_v56 = vmax.f32 %v407_v55, 0.0 }
  0xac   :  { %v630_v57 = vsel %vm626_vm2, %v563_v56, 0.0 }
  0xad   :  { %v631_v58 = vadd.f32 %v630_v57, %v629_v51  ;;  %v1242_v59 = vpop.f32.mrf.mxu2 }
  0xae   :  { %v1244_v60 = vpop.f32.mrf.mxu3 }
  0xaf   :  { %v408_v61 = vpop.f32.mrf.mxu0 }
  0xb0   :  { %v409_v62 = vadd.f32 %v1224_v41, %v408_v61  ;;  %v1269_v28 = vpop.f32.mrf.mxu1 }
  0xb2   :  { %v564_v0 = vmax.f32 %v409_v62, 0.0 }
  0xb4   :  { %v632_v1 = vsel %vm626_vm2, %v564_v0, 0.0 }
  0xb5   :  { %v633_v2 = vadd.f32 %v632_v1, %v631_v58  ;;  %v1250_v3 = vpop.f32.mrf.mxu2 }
  0xb6   :  { %v1252_v5 = vpop.f32.mrf.mxu3 }
  0xb7   :  { %v411_v4 = vpop.f32.mrf.mxu0 }
  0xb8   :  { %v412_v6 = vadd.f32 %v1224_v41, %v411_v4  ;;  %v1278_v35 = vpop.f32.mrf.mxu1 }
  0xba   :  { %v565_v7 = vmax.f32 %v412_v6, 0.0 }
  0xbc   :  { %v634_v9 = vsel %vm626_vm2, %v565_v7, 0.0 }
  0xbd   :  { %v635_v10 = vadd.f32 %v634_v9, %v633_v2  ;;  %v481_v11 = vpop.f32.mrf.mxu2 }
  0xbe   :  { %v1258_v13 = vpop.f32.mrf.mxu3  ;;  %v482_v14 = vadd.f32 %v1224_v41, %v481_v11 }
  0xbf   :  { %v413_v12 = vpop.f32.mrf.mxu0 }
  0xc0   :  { %v593_v17 = vmax.f32 %v482_v14, 0.0  ;;  %v1284_v39 = vpop.f32.mrf.mxu1  ;;  %v414_v54 = vadd.f32 %v1224_v41, %v413_v12 }
  0xc2   :  { %v696_v21 = vsel %vm626_vm2, %v593_v17, 0.0  ;;  %v566_v58 = vmax.f32 %v414_v54, 0.0 }
  0xc4   :  { %v636_v4 = vsel %vm626_vm2, %v566_v58, 0.0 }
  0xc5   :  { %v483_v15 = vpop.f32.mrf.mxu2 }
  0xc6   :  { %v484_v18 = vadd.f32 %v1224_v41, %v483_v15  ;;  %v1266_v24 = vpop.f32.mrf.mxu3  ;;  %v637_v15 = vadd.f32 %v636_v4, %v635_v10  ;;  %v783_v4 = vld [vmem:[%s1503_s3 + $0x28] sm:$0xff] }
  0xc7   :  { %v416_v19 = vpop.f32.mrf.mxu0  ;;  %803 = vmatpush.msrb.mxu1 %v783_v4 }
  0xc8   :  { %v594_v20 = vmax.f32 %v484_v18, 0.0  ;;  %v1292_v47 = vpop.f32.mrf.mxu1  ;;  %v417_v57 = vadd.f32 %v1224_v41, %v416_v19 }
  0xca   :  { %v697_v22 = vsel %vm626_vm2, %v594_v20, 0.0  ;;  %v567_v62 = vmax.f32 %v417_v57, 0.0 }
  0xcb   :  { %v698_v23 = vadd.f32 %v697_v22, %v696_v21 }
  0xcc   :  { %v638_v11 = vsel %vm626_vm2, %v567_v62, 0.0 }
  0xcd   :  { %v486_v25 = vpop.f32.mrf.mxu2  ;;  %v639_v21 = vadd.f32 %v638_v11, %v637_v15  ;;  %v442_v11 = vadd.f32 %v1224_v41, %v1247_v63 }
  0xce   :  { %v487_v26 = vadd.f32 %v1224_v41, %v486_v25  ;;  %v1276_v33 = vpop.f32.mrf.mxu3 }
  0xcf   :  { %v418_v27 = vpop.f32.mrf.mxu0 }
  0xd0   :  { %v595_v29 = vmax.f32 %v487_v26, 0.0  ;;  %v1302_v56 = vpop.f32.mrf.mxu1  ;;  %v419_v61 = vadd.f32 %v1224_v41, %v418_v27 }
  0xd2   :  { %v699_v30 = vsel %vm626_vm2, %v595_v29, 0.0  ;;  %v568_v6 = vmax.f32 %v419_v61, 0.0 }
  0xd3   :  { %v1272_v31 = vadd.f32 %v699_v30, %v698_v23 }
  0xd4   :  { %v640_v18 = vsel %vm626_vm2, %v568_v6, 0.0 }
  0xd5   :  { %v1274_v32 = vpop.f32.mrf.mxu2  ;;  %v641_v26 = vadd.f32 %v640_v18, %v639_v21 }
  0xd6   :  { %v1282_v38 = vpop.f32.mrf.mxu3  ;;  %v489_v6 = vadd.f32 %v1224_v41, %v1274_v32  ;;  %v447_v32 = vadd.f32 %v1224_v41, %v1261_v16 }
  0xd7   :  { %v421_v34 = vpop.f32.mrf.mxu0 }
  0xd8   :  { %v422_v0 = vadd.f32 %v1224_v41, %v421_v34  ;;  %v1315_v17 = vpop.f32.mrf.mxu1 }
  0xda   :  { %v569_v12 = vmax.f32 %v422_v0, 0.0 }
  0xdc   :  { %v642_v22 = vsel %vm626_vm2, %v569_v12, 0.0 }
  0xdd   :  { %v1280_v36 = vpop.f32.mrf.mxu2  ;;  %v643_v34 = vadd.f32 %v642_v22, %v641_v26  ;;  %v596_v22 = vmax.f32 %v489_v6, 0.0  ;;  %v577_v26 = vmax.f32 %v442_v11, 0.0  ;;  %v454_v11 = vadd.f32 %v1224_v41, %v1284_v39 }
  0xde   :  { %v1288_v44 = vpop.f32.mrf.mxu3  ;;  %v492_v15 = vadd.f32 %v1224_v41, %v1280_v36 }
  0xdf   :  { %v423_v37 = vpop.f32.mrf.mxu0 }
  0xe0   :  { %v424_v7 = vadd.f32 %v1224_v41, %v423_v37  ;;  %v1333_v0 = vpop.f32.mrf.mxu1 }
  0xe2   :  { %v570_v19 = vmax.f32 %v424_v7, 0.0 }
  0xe4   :  { %v644_v29 = vsel %vm626_vm2, %v570_v19, 0.0  ;;  %v444_v19 = vadd.f32 %v1224_v41, %v1255_v8  ;;  %v449_v8 = vadd.f32 %v1224_v41, %v1269_v28  ;;  %v452_v28 = vadd.f32 %v1224_v41, %v1278_v35 }
  0xe5   :  { %v1286_v40 = vpop.f32.mrf.mxu2  ;;  %v645_v57 = vadd.f32 %v644_v29, %v643_v34 }
  0xe6   :  { %v1297_v50 = vpop.f32.mrf.mxu3  ;;  %v578_v34 = vmax.f32 %v444_v19, 0.0  ;;  %v580_v4 = vmax.f32 %v449_v8, 0.0 }
  0xe7   :  { %v426_v42 = vpop.f32.mrf.mxu0 }
  0xe8   :  { %v427_v14 = vadd.f32 %v1224_v41, %v426_v42 }
  0xea   :  { %v571_v23 = vmax.f32 %v427_v14, 0.0 }
  0xed   :  { %v1290_v46 = vpop.f32.mrf.mxu2 }
  0xee   :  { %v1309_v2 = vpop.f32.mrf.mxu3  ;;  %v497_v16 = vadd.f32 %v1224_v41, %v1290_v46  ;;  %v466_v46 = vpop.f32.mrf.mxu1 }
  0xef   :  { %v428_v49 = vpop.f32.mrf.mxu0 }
  0xf0   :  { %v429_v20 = vadd.f32 %v1224_v41, %v428_v49  ;;  %v646_v49 = vsel %vm626_vm2, %v571_v23, 0.0  ;;  %v494_v23 = vadd.f32 %v1224_v41, %v1286_v40  ;;  %v701_v40 = vsel %vm626_vm2, %v596_v22, 0.0 }
  0xf1   :  { %v647_v62 = vadd.f32 %v646_v49, %v645_v57  ;;  %v658_v57 = vsel %vm626_vm2, %v577_v26, 0.0  ;;  %v599_v6 = vmax.f32 %v497_v16, 0.0  ;;  %v459_v26 = vadd.f32 %v1224_v41, %v1302_v56 }
  0xf2   :  { %v572_v30 = vmax.f32 %v429_v20, 0.0  ;;  %v598_v49 = vmax.f32 %v494_v23, 0.0 }
  0xf3   :  { %v707_v22 = vsel %vm626_vm2, %v599_v6, 0.0  ;;  %v467_v6 = vadd.f32 %v1224_v41, %v466_v46 }
  0xf4   :  { %v648_v58 = vsel %vm626_vm2, %v572_v30, 0.0  ;;  %v597_v30 = vmax.f32 %v492_v15, 0.0  ;;  %v705_v15 = vsel %vm626_vm2, %v598_v49, 0.0  ;;  %v464_v49 = vadd.f32 %v1224_v41, %v1333_v0 }
  0xf5   :  { %v1299_v51 = vpop.f32.mrf.mxu2  ;;  %v649_v12 = vadd.f32 %v648_v58, %v647_v62 }
  0xf6   :  { %v1325_v42 = vpop.f32.mrf.mxu3  ;;  %v703_v62 = vsel %vm626_vm2, %v597_v30, 0.0 }
  0xf7   :  { %v431_v55 = vpop.f32.mrf.mxu0 }
  0xf8   :  { %v432_v25 = vadd.f32 %v1224_v41, %v431_v55 }
  0xfa   :  { %v573_v54 = vmax.f32 %v432_v25, 0.0 }
  0xfc   :  { %v650_v7 = vsel %vm626_vm2, %v573_v54, 0.0  ;;  %v499_v54 = vadd.f32 %v1224_v41, %v1299_v51  ;;  %v660_v51 = vsel %vm626_vm2, %v578_v34, 0.0 }
  0xfd   :  { %v1307_v1 = vpop.f32.mrf.mxu2  ;;  %v651_v20 = vadd.f32 %v650_v7, %v649_v12 }
  0xfe   :  { %v1354_v29 = vpop.f32.mrf.mxu3  ;;  %v502_v7 = vadd.f32 %v1224_v41, %v1307_v1  ;;  %v457_v1 = vadd.f32 %v1224_v41, %v1292_v47  ;;  %v462_v47 = vadd.f32 %v1224_v41, %v1315_v17  ;;  %v584_v17 = vmax.f32 %v459_v26, 0.0 }
  0xff   :  { %v433_v9 = vpop.f32.mrf.mxu0 }
 0x100   :  { %v434_v10 = vadd.f32 %v1224_v41, %v433_v9  ;;  %v601_v39 = vmax.f32 %v502_v7, 0.0  ;;  %v672_v46 = vsel %vm626_vm2, %v584_v17, 0.0 }
 0x102   :  { %v574_v61 = vmax.f32 %v434_v10, 0.0 }
 0x104   :  { %v652_v18 = vsel %vm626_vm2, %v574_v61, 0.0 }
 0x105   :  { %v1321_v27 = vpop.f32.mrf.mxu2  ;;  %v653_v36 = vadd.f32 %v652_v18, %v651_v20  ;;  %v600_v18 = vmax.f32 %v499_v54, 0.0  ;;  %v581_v20 = vmax.f32 %v452_v28, 0.0 }
 0x106   :  { %v504_v19 = vadd.f32 %v1224_v41, %v1321_v27  ;;  %v1385_v27 = vpop.f32.mrf.mxu3 }
 0x107   :  { %v436_v37 = vpop.f32.mrf.mxu0  ;;  %v709_v30 = vsel %vm626_vm2, %v600_v18, 0.0  ;;  %v666_v34 = vsel %vm626_vm2, %v581_v20, 0.0  ;;  %v517_v18 = vadd.f32 %v1224_v41, %v1231_v45 }
 0x108   :  { %v437_v55 = vadd.f32 %v1224_v41, %v436_v37  ;;  %v579_v37 = vmax.f32 %v447_v32, 0.0  ;;  %v602_v8 = vmax.f32 %v504_v19, 0.0 }
 0x10a   :  { %v575_v9 = vmax.f32 %v437_v55, 0.0  ;;  %v662_v35 = vsel %vm626_vm2, %v579_v37, 0.0 }
 0x10c   :  { %v654_v63 = vsel %vm626_vm2, %v575_v9, 0.0  ;;  %v702_v9 = vadd.f32 %v701_v40, %v1272_v31  ;;  %v711_v40 = vsel %vm626_vm2, %v601_v39, 0.0 }
 0x10d   :  { %v506_v14 = vpop.f32.mrf.mxu2  ;;  %v655_v48 = vadd.f32 %v654_v63, %v653_v36 }
 0x10e   :  { %v704_v32 = vadd.f32 %v703_v62, %v702_v9  ;;  %v507_v23 = vadd.f32 %v1224_v41, %v506_v14  ;;  %v583_v14 = vmax.f32 %v457_v1, 0.0  ;;  %v585_v62 = vmax.f32 %v462_v47, 0.0 }
 0x10f   :  { %v438_v21 = vpop.f32.mrf.mxu0 }
 0x110   :  { %v439_v25 = vadd.f32 %v1224_v41, %v438_v21  ;;  %v664_v21 = vsel %vm626_vm2, %v580_v4, 0.0  ;;  %v706_v63 = vadd.f32 %v705_v15, %v704_v32  ;;  %v603_v56 = vmax.f32 %v507_v23, 0.0 }
 0x111   :  { %v670_v9 = vsel %vm626_vm2, %v583_v14, 0.0  ;;  %v472_v15 = vadd.f32 %v1224_v41, %v1229_v43  ;;  %v674_v20 = vsel %vm626_vm2, %v585_v62, 0.0 }
 0x112   :  { %v576_v10 = vmax.f32 %v439_v25, 0.0  ;;  %v582_v25 = vmax.f32 %v454_v11, 0.0  ;;  %v715_v0 = vsel %vm626_vm2, %v603_v56, 0.0  ;;  %v586_v11 = vmax.f32 %v464_v49, 0.0 }
 0x113   :  { %v477_v56 = vadd.f32 %v1224_v41, %v1242_v59  ;;  %v527_v59 = vadd.f32 %v1224_v41, %v1258_v13 }
 0x114   :  { %v656_v55 = vsel %vm626_vm2, %v576_v10, 0.0  ;;  %v708_v10 = vadd.f32 %v707_v22, %v706_v63  ;;  %v1411_v63 = vpop.f32.mrf.mxu3  ;;  %v676_v43 = vsel %vm626_vm2, %v586_v11, 0.0 }
 0x115   :  { %v657_v58 = vadd.f32 %v656_v55, %v655_v48  ;;  %v508_v61 = vpop.f32.mrf.mxu2 }
 0x116   :  { %v509_v16 = vadd.f32 %v1224_v41, %v508_v61  ;;  %v710_v55 = vadd.f32 %v709_v30, %v708_v10  ;;  %v713_v61 = vsel %vm626_vm2, %v602_v8, 0.0  ;;  %v474_v30 = vadd.f32 %v1224_v41, %v1236_v52 }
 0x117   :  { %v659_v12 = vadd.f32 %v658_v57, %v657_v58  ;;  %v668_v57 = vsel %vm626_vm2, %v582_v25, 0.0  ;;  %v468_v58 = vpop.f32.mrf.mxu1  ;;  %v524_v52 = vadd.f32 %v1224_v41, %v1252_v5 }
 0x118   :  { %v604_v4 = vmax.f32 %v509_v16, 0.0  ;;  %v712_v7 = vadd.f32 %v711_v40, %v710_v55  ;;  %v607_v16 = vmax.f32 %v517_v18, 0.0  ;;  %v782_v40 = vld [vmem:[%s1503_s3 + $0x20] sm:$0xff]  ;;  %v590_v55 = vmax.f32 %v474_v30, 0.0 }
 0x119   :  { %v661_v31 = vadd.f32 %v660_v51, %v659_v12  ;;  %804 = vmatpush.msrb.mxu1 %v782_v40  ;;  %v611_v18 = vmax.f32 %v527_v59, 0.0  ;;  %v539_v30 = vadd.f32 %v1224_v41, %v1297_v50  ;;  %v547_v50 = vadd.f32 %v1224_v41, %v1354_v29  ;;  %v779_v29 = vld [vmem:[%s1503_s3 + $0x8] sm:$0xff] }
 0x11a   :  { %v714_v19 = vadd.f32 %v713_v61, %v712_v7  ;;  %v717_v1 = vsel %vm626_vm2, %v604_v4, 0.0  ;;  %v781_v4 = vld [vmem:[%s1503_s3 + $0x18] sm:$0xff]  ;;  %v684_v13 = vsel %vm626_vm2, %v590_v55, 0.0 }
 0x11b   :  { %v663_v36 = vadd.f32 %v662_v35, %v661_v31  ;;  %v469_v35 = vadd.f32 %v1224_v41, %v468_v58  ;;  %v587_v31 = vmax.f32 %v467_v6, 0.0  ;;  %v723_v58 = vsel %vm626_vm2, %v607_v16, 0.0  ;;  %805 = vmatpush.msrb.mxu1 %v781_v4 }
 0x11c   :  { %v716_v22 = vadd.f32 %v715_v0, %v714_v19  ;;  %v591_v6 = vmax.f32 %v477_v56, 0.0  ;;  %v532_v19 = vadd.f32 %v1224_v41, %v1276_v33  ;;  %v537_v33 = vadd.f32 %v1224_v41, %v1288_v44 }
 0x11d   :  { %v665_v37 = vadd.f32 %v664_v21, %v663_v36  ;;  %v511_v48 = vpop.f32.mrf.mxu2  ;;  %v519_v21 = vadd.f32 %v1224_v41, %v1238_v53  ;;  %v588_v26 = vmax.f32 %v469_v35, 0.0  ;;  %v589_v36 = vmax.f32 %v472_v15, 0.0 }
 0x11e   :  { %v512_v54 = vadd.f32 %v1224_v41, %v511_v48  ;;  %v718_v47 = vadd.f32 %v717_v1, %v716_v22  ;;  %v522_v53 = vadd.f32 %v1224_v41, %v1244_v60  ;;  %v678_v10 = vsel %vm626_vm2, %v587_v31, 0.0 }
 0x11f   :  { %v667_v28 = vadd.f32 %v666_v34, %v665_v37  ;;  %v608_v14 = vmax.f32 %v519_v21, 0.0  ;;  %v680_v60 = vsel %vm626_vm2, %v588_v26, 0.0  ;;  %v534_v31 = vadd.f32 %v1224_v41, %v1282_v38 }
 0x120   :  { %v605_v12 = vmax.f32 %v512_v54, 0.0  ;;  %v682_v54 = vsel %vm626_vm2, %v589_v36, 0.0  ;;  %v609_v61 = vmax.f32 %v522_v53, 0.0  ;;  %v542_v16 = vadd.f32 %v1224_v41, %v1309_v2 }
 0x121   :  { %v669_v51 = vadd.f32 %v668_v57, %v667_v28  ;;  %v479_v28 = vadd.f32 %v1224_v41, %v1250_v3  ;;  %v725_v7 = vsel %vm626_vm2, %v608_v14, 0.0  ;;  %v529_v3 = vadd.f32 %v1224_v41, %v1266_v24 }
 0x122   :  { %v719_v45 = vsel %vm626_vm2, %v605_v12, 0.0  ;;  %v553_v12 = vpop.f32.mrf.mxu3  ;;  %v727_v15 = vsel %vm626_vm2, %v609_v61, 0.0  ;;  %v686_v24 = vsel %vm626_vm2, %v591_v6, 0.0  ;;  %v614_v36 = vmax.f32 %v534_v31, 0.0  ;;  %v778_v61 = vld [vmem:[%s1503_s3] sm:$0xff] }
 0x123   :  { %v671_v32 = vadd.f32 %v670_v9, %v669_v51  ;;  %v720_v48 = vadd.f32 %v719_v45, %v718_v47  ;;  %v610_v9 = vmax.f32 %v524_v52, 0.0  ;;  %v1049_v51 = vmov 0.0  }
 0x124   :  { %26 = vst.msk [vmem:[#allocation2] sm:$0x3] %vm25_vm3, %v1049_v51  ;;  %v592_v35 = vmax.f32 %v479_v28, 0.0  ;;  %v612_v1 = vmax.f32 %v529_v3, 0.0  ;;  %v615_v47 = vmax.f32 %v537_v33, 0.0  ;;  %v616_v44 = vmax.f32 %v539_v30, 0.0 }
 0x125   :  { %v673_v39 = vadd.f32 %v672_v46, %v671_v32  ;;  %v513_v23 = vpop.f32.mrf.mxu2  ;;  %v544_v14 = vadd.f32 %v1224_v41, %v1325_v42  ;;  %v617_v40 = vmax.f32 %v542_v16, 0.0  ;;  %v549_v2 = vadd.f32 %v1224_v41, %v1385_v27 }
 0x126   :  { %v514_v25 = vadd.f32 %v1224_v41, %v513_v23  ;;  %v731_v23 = vsel %vm626_vm2, %v611_v18, 0.0  ;;  %v733_v26 = vsel %vm626_vm2, %v612_v1, 0.0  ;;  %v741_v52 = vsel %vm626_vm2, %v616_v44, 0.0 }
 0x127   :  { %v675_v8 = vadd.f32 %v674_v20, %v673_v39  ;;  %v729_v20 = vsel %vm626_vm2, %v610_v9, 0.0  ;;  %v688_v39 = vsel %vm626_vm2, %v592_v35, 0.0  ;;  %v619_v55 = vmax.f32 %v547_v50, 0.0 }
 0x128   :  { %v606_v34 = vmax.f32 %v514_v25, 0.0  ;;  %v552_v42 = vadd.f32 %v1224_v41, %v1411_v63  ;;  %v620_v27 = vmax.f32 %v549_v2, 0.0 }
 0x129   :  { %v677_v37 = vadd.f32 %v676_v43, %v675_v8  ;;  %v613_v43 = vmax.f32 %v532_v19, 0.0 }
 0x12a   :  { %v721_v49 = vsel %vm626_vm2, %v606_v34, 0.0  ;;  %v737_v34 = vsel %vm626_vm2, %v614_v36, 0.0 }
 0x12b   :  { %v679_v57 = vadd.f32 %v678_v10, %v677_v37  ;;  %v722_v17 = vadd.f32 %v721_v49, %v720_v48  ;;  %v735_v38 = vsel %vm626_vm2, %v613_v43, 0.0  ;;  %v556_v10 = vpop.f32.mrf.mxu3  ;;  %v739_v48 = vsel %vm626_vm2, %v615_v47, 0.0 }
 0x12c   :  { %v618_v49 = vmax.f32 %v544_v14, 0.0  ;;  %v557_v4 = vadd.f32 %v1224_v41, %v556_v10 }
 0x12d   :  { %v724_v5 = vadd.f32 %v723_v58, %v722_v17  ;;  %v681_v62 = vadd.f32 %v680_v60, %v679_v57  ;;  %v780_v57 = vld [vmem:[%s1503_s3 + $0x10] sm:$0xff]  ;;  %v554_v58 = vadd.f32 %v1224_v41, %v553_v12 }
 0x12e   :  { %806 = vmatpush.msrb.mxu1 %v780_v57  ;;  %v745_v28 = vsel %vm626_vm2, %v618_v49, 0.0 }
 0x12f   :  { %v726_v0 = vadd.f32 %v725_v7, %v724_v5  ;;  %v683_v11 = vadd.f32 %v682_v54, %v681_v62  ;;  %v743_v54 = vsel %vm626_vm2, %v617_v40, 0.0  ;;  %v747_v5 = vsel %vm626_vm2, %v619_v55, 0.0 }
 0x130   :  { %807 = vmatpush.msrb.mxu1 %v779_v29  ;;  %v621_v62 = vmax.f32 %v552_v42, 0.0  ;;  %v749_v7 = vsel %vm626_vm2, %v620_v27, 0.0  ;;  %v622_v9 = vmax.f32 %v554_v58, 0.0 }
 0x131   :  { %v728_v32 = vadd.f32 %v727_v15, %v726_v0  ;;  %v685_v46 = vadd.f32 %v684_v13, %v683_v11  ;;  %v623_v11 = vmax.f32 %v557_v4, 0.0 }
 0x132   :  { %808 = vmatpush.msrb.mxu1 %v778_v61  ;;  %v751_v0 = vsel %vm626_vm2, %v621_v62, 0.0  ;;  %v753_v35 = vsel %vm626_vm2, %v622_v9, 0.0 }
 0x133   :  { %v730_v21 = vadd.f32 %v729_v20, %v728_v32  ;;  %v687_v22 = vadd.f32 %v686_v24, %v685_v46  ;;  %v558_v59 = vpop.f32.mrf.mxu3  ;;  %v755_v32 = vsel %vm626_vm2, %v623_v11, 0.0 }
 0x134   :  { %v559_v3 = vadd.f32 %v1224_v41, %v558_v59 }
 0x135   :  { %v732_v45 = vadd.f32 %v731_v23, %v730_v21  ;;  %v689_v25 = vadd.f32 %v688_v39, %v687_v22 }
 0x136   :  { %v624_v15 = vmax.f32 %v559_v3, 0.0 }
 0x137   :  { %v734_v8 = vadd.f32 %v733_v26, %v732_v45  ;;  %v690_v51 = vrot.slane %v689_v25, 4  ;;  %v625_v45 = vld [vmem:[#allocation2] sm:$0x3] }
 0x138   :  { %v757_v24 = vsel %vm626_vm2, %v624_v15, 0.0 }
 0x139   :  { %v736_v53 = vadd.f32 %v735_v38, %v734_v8  ;;  %v691_v18 = vadd.f32 %v690_v51, %v689_v25  ;;  %v1048_v38 = vld [vmem:[%s1504_s4] ss:$0 sm:$0xff] }
 0x13b   :  { %v738_v37 = vadd.f32 %v737_v34, %v736_v53  ;;  %v692_v20 = vrot.slane %v691_v18, 2 }
 0x13d   :  { %v740_v56 = vadd.f32 %v739_v48, %v738_v37  ;;  %v693_v41 = vadd.f32 %v692_v20, %v691_v18 }
 0x13f   :  { %v742_v60 = vadd.f32 %v741_v52, %v740_v56  ;;  %v694_v39 = vrot.slane %v693_v41, 1 }
 0x141   :  { %v744_v17 = vadd.f32 %v743_v54, %v742_v60  ;;  %v695_v33 = vadd.f32 %v694_v39, %v693_v41 }
 0x143   :  { %v746_v63 = vadd.f32 %v745_v28, %v744_v17 }
 0x145   :  { %v748_v6 = vadd.f32 %v747_v5, %v746_v63 }
 0x147   :  { %v750_v13 = vadd.f32 %v749_v7, %v748_v6 }
 0x149   :  { %v752_v12 = vadd.f32 %v751_v0, %v750_v13 }
 0x14b   :  { %v754_v19 = vadd.f32 %v753_v35, %v752_v12 }
 0x14d   :  { %v756_v46 = vadd.f32 %v755_v32, %v754_v19 }
 0x14f   :  { %v758_v1 = vadd.f32 %v757_v24, %v756_v46 }
 0x151   :  { %v759_v31 = vrot.slane %v758_v1, 4 }
 0x153   :  { %v760_v21 = vadd.f32 %v759_v31, %v758_v1 }
 0x155   :  { %v761_v22 = vrot.slane %v760_v21, 2 }
 0x157   :  { %v762_v23 = vadd.f32 %v761_v22, %v760_v21 }
 0x159   :  { %v763_v43 = vrot.slane %v762_v23, 1 }
 0x15b   :  { %v764_v26 = vadd.f32 %v763_v43, %v762_v23 }
 0x15d   :  { %v768_v25 = vsel %vm767_vm4, %v764_v26, %v695_v33 }
 0x15e   :  { %v770_v36 = vadd.f32 %v768_v25, %v625_v45 }
 0x160   :  { %772 = vst.msk [vmem:[#allocation2] sm:$0x3] %vm25_vm3, %v770_v36 }
 0x167   :  { %v776_v30 = vld [vmem:[#allocation2] sm:$0x3] }
 0x168   :  { %v777_v8 = vmul.f32 0.00390625, %v776_v30 }
 0x16a   :  { %994 = vmatmul.msk.f32.vlgmr.msrb.gmra.mxu1 %vm626_vm2, %v777_v8 }
 0x1e7   :  { %v810_v47 = vpop.f32.mrf.mxu1 }
 0x1e8   :  { %v811_v16 = vadd.f32 %v1048_v38, %v810_v47 }
 0x1ea   :  { %813 = vst [vmem:[%s1505_s5] sm:$0x3] %v811_v16 }

</bundles_post_ra>
